<compile_context>
chip_gen: v7x
topology: tpu7x:2x2x1
jax: 0.10.0
libtpu: 0.0.40
codegen_flags: <defaults>
</compile_context>

<pallas_src>
import math

import jax
import jax.numpy as jnp
from jax.experimental import pallas as pl
from jax.experimental.pallas import tpu as pltpu


def attproj_kernel(x_ref, w1_ref, b1_ref, w2_ref, b2_ref, seg_ref, o_ref):
    # All refs hold "row-packed" data: each packed row carries R original batch
    # rows side by side along the lane axis; the weights are block-diagonal so
    # one MXU matmul computes R independent nn.Linear rows at once.
    x = x_ref[...]

    # fc1 + ReLU (MXU matmul, f32 accumulation; epilogue in f32).
    h = jnp.dot(x.astype(w1_ref.dtype), w1_ref[...],
                preferred_element_type=jnp.float32)
    h = jnp.maximum(h + b1_ref[...].astype(jnp.float32), 0.0)

    # fc2.
    y = jnp.dot(h.astype(w2_ref.dtype), w2_ref[...],
                preferred_element_type=jnp.float32)
    y = y + b2_ref[...].astype(jnp.float32)

    # F.normalize(y, p=2, dim=1), eps=1e-12. Under packing the sum of squares
    # is a segmented reduce over each original row's D_out lanes: a single
    # matmul against a block-diagonal ones matrix both reduces and broadcasts
    # the per-row sums back across each segment (stays lane-dense, on the MXU).
    ssq = jnp.dot(y * y, seg_ref[...], preferred_element_type=jnp.float32)
    inv = jax.lax.rsqrt(jnp.maximum(ssq, 1e-24))  # clamp the *squared* norm (eps^2)
    o_ref[...] = (y * inv).astype(o_ref.dtype)


def _block_diag(w, r):
    """r copies of w along the diagonal: (r*w.shape[0], r*w.shape[1])."""
    return jnp.kron(jnp.eye(r, dtype=w.dtype), w)


def attproj(x, w1, b1, w2, b2, *, group_rows=8, block_rows=8192):
    """AttProj forward.

    x : (B, D_in)   w1: (D_in, H)   b1: (1, H)   w2: (H, D_out)   b2: (1, D_out)

    group_rows: batch rows packed per lane group (8 for v6e/v7x, 4 for v5e).
    block_rows: original batch rows per grid step (2048-8192; keep grid >= 2).
    The packed weights are tiny (<1 MiB) -- hoist the packing in a real model.
    """
    B, D_in = x.shape
    H = w1.shape[1]
    D_out = w2.shape[1]
    R = max(1, group_rows)

    # --- one-time parameter packing (block-diagonal weights, tiled biases) ---
    w1p = _block_diag(w1, R)                                     # (R*D_in, R*H)
    w2p = _block_diag(w2, R)                                     # (R*H, R*D_out)
    b1p = jnp.tile(b1, (1, R))                                   # (1, R*H)
    b2p = jnp.tile(b2, (1, R))                                   # (1, R*D_out)
    seg = _block_diag(jnp.ones((D_out, D_out), jnp.float32), R)  # (R*D_out, R*D_out)

    # --- batch tiling (in packed rows) ---
    bg_raw = pl.cdiv(B, R)                                   # packed rows needed
    tbg = max(8, min(max(1, block_rows // R), bg_raw))
    tbg = pl.cdiv(tbg, 8) * 8                                 # sublane multiple
    if bg_raw > 8 and pl.cdiv(bg_raw, tbg) < 2:
        # Keep >= 2 grid steps so v7x's two TensorCores both get work.
        tbg = max(8, pl.cdiv(pl.cdiv(bg_raw, 2), 8) * 8)
    grid_b = pl.cdiv(bg_raw, tbg)
    bg = grid_b * tbg                                         # padded packed rows
    bp = bg * R                                               # padded original rows

    # Zero-pad so every tile is full (padded rows stay finite, sliced away),
    # then fold R rows per packed row -- a free re-view of row-major bytes.
    xp = x if bp == B else jnp.pad(x, ((0, bp - B), (0, 0)))
    xp = xp.reshape(bg, R * D_in)

    const = lambda a: pl.BlockSpec(a.shape, lambda i: (0, 0))  # VMEM-resident

    out_packed = pl.pallas_call(
        attproj_kernel,
        out_shape=jax.ShapeDtypeStruct((bg, R * D_out), x.dtype),
        grid=(grid_b,),
        in_specs=[
            pl.BlockSpec((tbg, R * D_in), lambda i: (i, 0)),   # x: streamed over batch
            const(w1p), const(b1p), const(w2p), const(b2p), const(seg),
        ],
        out_specs=pl.BlockSpec((tbg, R * D_out), lambda i: (i, 0)),
        compiler_params=pltpu.CompilerParams(
            dimension_semantics=("parallel",),                 # v7x: shard batch over 2 TCs
        ),
    )(xp, w1p, b1p, w2p, b2p, seg)

    # Unpack: (bg, R*D_out) row-major is bit-identical to (bp, D_out).
    return out_packed.reshape(bp, D_out)[:B]


def xavier_uniform(key, fan_out, fan_in, dtype=jnp.float32):
    # matches nn.init.xavier_uniform_ on a (fan_out, fan_in) torch weight
    bound = math.sqrt(6.0 / (fan_in + fan_out))
    return jax.random.uniform(key, (fan_out, fan_in), dtype, -bound, bound)


def linear_bias_init(key, fan_in, dim, dtype=jnp.float32):
    # default nn.Linear bias init: U(-1/sqrt(fan_in), 1/sqrt(fan_in))
    bound = 1.0 / math.sqrt(fan_in)
    return jax.random.uniform(key, (1, dim), dtype, -bound, bound)


if __name__ == "__main__":
    # Module-consistent small shapes: att_DIM=32, att_mapHidDIM=64,
    # att_mapOutDIM=16. B=128 with group_rows=8 -> 16 packed rows, split into
    # a 2-step batch grid (exercises packing, pipelining and megacore path).
    B, ATT_DIM, HID_DIM, OUT_DIM = 128, 32, 64, 16

    key = jax.random.PRNGKey(0)
    kx, kw1, kb1, kw2, kb2 = jax.random.split(key, 5)

    x = jax.random.normal(kx, (B, ATT_DIM), jnp.float32)

    # fc1: torch weight (HID, ATT) xavier-uniform -> stored transposed (ATT, HID)
    w1 = xavier_uniform(kw1, HID_DIM, ATT_DIM).T
    b1 = linear_bias_init(kb1, ATT_DIM, HID_DIM)
    # fc2: torch weight (OUT, HID) xavier-uniform -> stored transposed (HID, OUT)
    w2 = xavier_uniform(kw2, OUT_DIM, HID_DIM).T
    b2 = linear_bias_init(kb2, HID_DIM, OUT_DIM)

    out = attproj(x, w1, b1, w2, b2, group_rows=8)
    jax.block_until_ready(out)

    # Reference check in plain JAX (same semantics as the PyTorch module).
    h_ref = jnp.maximum(x @ w1 + b1, 0.0)
    y_ref = h_ref @ w2 + b2
    n_ref = jnp.maximum(jnp.sqrt(jnp.sum(y_ref * y_ref, axis=1, keepdims=True)), 1e-12)
    ref = y_ref / n_ref

    assert out.shape == (B, OUT_DIM)
    assert jnp.allclose(out, ref, atol=2e-5, rtol=2e-5), "mismatch vs reference"

    print("KERNEL_OK")
</pallas_src>

<mosaic_0001>
module attributes {stable_mosaic.version = 11 : i64} {
  func.func @attproj_kernel(%arg0: i32, %arg1: memref<8x256xf32, #tpu.memory_space<vmem>>, %arg2: memref<256x512xf32, #tpu.memory_space<vmem>>, %arg3: memref<1x512xf32, #tpu.memory_space<vmem>>, %arg4: memref<512x128xf32, #tpu.memory_space<vmem>>, %arg5: memref<1x128xf32, #tpu.memory_space<vmem>>, %arg6: memref<128x128xf32, #tpu.memory_space<vmem>>, %arg7: memref<8x128xf32, #tpu.memory_space<vmem>>) attributes {dimension_semantics = [#tpu.dimension_semantics<parallel>], iteration_bounds = array<i64: 2>, scalar_prefetch = 0 : i64, scratch_operands = 0 : i64, tpu.core_type = #tpu.core_type<tc>, window_params = [{transform_indices = @transform_0, window_bounds = array<i64: 8, 256>}, {pipeline_mode = #tpu.pipeline_mode<synchronous>, transform_indices = @transform_1, window_bounds = array<i64: 256, 512>}, {pipeline_mode = #tpu.pipeline_mode<synchronous>, transform_indices = @transform_2, window_bounds = array<i64: 1, 512>}, {pipeline_mode = #tpu.pipeline_mode<synchronous>, transform_indices = @transform_3, window_bounds = array<i64: 512, 128>}, {pipeline_mode = #tpu.pipeline_mode<synchronous>, transform_indices = @transform_4, window_bounds = array<i64: 1, 128>}, {pipeline_mode = #tpu.pipeline_mode<synchronous>, transform_indices = @transform_5, window_bounds = array<i64: 128, 128>}, {transform_indices = @transform_6, window_bounds = array<i64: 8, 128>}]} {
    %c0 = arith.constant 0 : index
    %c0_0 = arith.constant 0 : index
    %0 = vector.load %arg1[%c0, %c0_0] : memref<8x256xf32, #tpu.memory_space<vmem>>, vector<8x256xf32>
    %c0_1 = arith.constant 0 : index
    %c0_2 = arith.constant 0 : index
    %1 = vector.load %arg2[%c0_1, %c0_2] : memref<256x512xf32, #tpu.memory_space<vmem>>, vector<256x512xf32>
    %cst = arith.constant dense<0.000000e+00> : vector<8x512xf32>
    %2 = tpu.matmul %0, %1, %cst {dimension_numbers = #tpu.dot_dimension_numbers<[1], [0], [0], [1], [0, 0, 1, 1], [], []>} : vector<8x256xf32>, vector<256x512xf32>, vector<8x512xf32> -> vector<8x512xf32>
    %c0_3 = arith.constant 0 : index
    %c0_4 = arith.constant 0 : index
    %3 = vector.load %arg3[%c0_3, %c0_4] : memref<1x512xf32, #tpu.memory_space<vmem>>, vector<1x512xf32>
    %4 = vector.broadcast %3 : vector<1x512xf32> to vector<8x512xf32>
    %5 = arith.addf %2, %4 : vector<8x512xf32>
    %cst_5 = arith.constant 0.000000e+00 : f32
    %6 = vector.broadcast %cst_5 : f32 to vector<8x512xf32>
    %7 = arith.maximumf %5, %6 : vector<8x512xf32>
    %c0_6 = arith.constant 0 : index
    %c0_7 = arith.constant 0 : index
    %8 = vector.load %arg4[%c0_6, %c0_7] : memref<512x128xf32, #tpu.memory_space<vmem>>, vector<512x128xf32>
    %cst_8 = arith.constant dense<0.000000e+00> : vector<8x128xf32>
    %9 = tpu.matmul %7, %8, %cst_8 {dimension_numbers = #tpu.dot_dimension_numbers<[1], [0], [0], [1], [0, 0, 1, 1], [], []>} : vector<8x512xf32>, vector<512x128xf32>, vector<8x128xf32> -> vector<8x128xf32>
    %c0_9 = arith.constant 0 : index
    %c0_10 = arith.constant 0 : index
    %10 = vector.load %arg5[%c0_9, %c0_10] : memref<1x128xf32, #tpu.memory_space<vmem>>, vector<1x128xf32>
    %11 = vector.broadcast %10 : vector<1x128xf32> to vector<8x128xf32>
    %12 = arith.addf %9, %11 : vector<8x128xf32>
    %13 = arith.mulf %12, %12 : vector<8x128xf32>
    %c0_11 = arith.constant 0 : index
    %c0_12 = arith.constant 0 : index
    %14 = vector.load %arg6[%c0_11, %c0_12] : memref<128x128xf32, #tpu.memory_space<vmem>>, vector<128x128xf32>
    %cst_13 = arith.constant dense<0.000000e+00> : vector<8x128xf32>
    %15 = tpu.matmul %13, %14, %cst_13 {dimension_numbers = #tpu.dot_dimension_numbers<[1], [0], [0], [1], [0, 0, 1, 1], [], []>} : vector<8x128xf32>, vector<128x128xf32>, vector<8x128xf32> -> vector<8x128xf32>
    %cst_14 = arith.constant 1.000000e-24 : f32
    %16 = vector.broadcast %cst_14 : f32 to vector<8x128xf32>
    %17 = arith.maximumf %15, %16 : vector<8x128xf32>
    %18 = math.rsqrt %17 : vector<8x128xf32>
    %19 = arith.mulf %12, %18 : vector<8x128xf32>
    %c0_15 = arith.constant 0 : index
    %c0_16 = arith.constant 0 : index
    %20 = vector.load %arg7[%c0_15, %c0_16] : memref<8x128xf32, #tpu.memory_space<vmem>>, vector<8x128xf32>
    tpu.vector_store %arg7[%c0_15, %c0_16], %19 {strides = array<i32>} : memref<8x128xf32, #tpu.memory_space<vmem>>, vector<8x128xf32>,
    return
  }
  func.func @transform_0(%arg0: i32) -> (i32, i32) {
    %c0_i32 = arith.constant 0 : i32
    %c0_i32_0 = arith.constant 0 : i32
    return %arg0, %c0_i32 : i32, i32
  }
  func.func @transform_1(%arg0: i32) -> (i32, i32) {
    %c0_i32 = arith.constant 0 : i32
    %c0_i32_0 = arith.constant 0 : i32
    %c0_i32_1 = arith.constant 0 : i32
    return %c0_i32, %c0_i32_0 : i32, i32
  }
  func.func @transform_2(%arg0: i32) -> (i32, i32) {
    %c0_i32 = arith.constant 0 : i32
    %c0_i32_0 = arith.constant 0 : i32
    %c0_i32_1 = arith.constant 0 : i32
    return %c0_i32, %c0_i32_0 : i32, i32
  }
  func.func @transform_3(%arg0: i32) -> (i32, i32) {
    %c0_i32 = arith.constant 0 : i32
    %c0_i32_0 = arith.constant 0 : i32
    %c0_i32_1 = arith.constant 0 : i32
    return %c0_i32, %c0_i32_0 : i32, i32
  }
  func.func @transform_4(%arg0: i32) -> (i32, i32) {
    %c0_i32 = arith.constant 0 : i32
    %c0_i32_0 = arith.constant 0 : i32
    %c0_i32_1 = arith.constant 0 : i32
    return %c0_i32, %c0_i32_0 : i32, i32
  }
  func.func @transform_5(%arg0: i32) -> (i32, i32) {
    %c0_i32 = arith.constant 0 : i32
    %c0_i32_0 = arith.constant 0 : i32
    %c0_i32_1 = arith.constant 0 : i32
    return %c0_i32, %c0_i32_0 : i32, i32
  }
  func.func @transform_6(%arg0: i32) -> (i32, i32) {
    %c0_i32 = arith.constant 0 : i32
    %c0_i32_0 = arith.constant 0 : i32
    return %arg0, %c0_i32 : i32, i32
  }
}

</mosaic_0001>

<bundles_post_ra>
// kernel: tpu_custom_call.1
= control target key start
LH: loop header
LB: loop body
LE: loop exit
PB: predicated region body
PF: predicated region fallthrough
CT: control target
= control target key end

     0   :  { %s1969_s0 = inlined_call_operand.hbm [shape: f32[16,256], index: 0, kind: input, shape index: {}]   ;;  %s1970_s1 = inlined_call_operand.hbm [shape: f32[256,512], index: 1, kind: input, shape index: {}]   ;;  %s1971_s2 = inlined_call_operand.vmem [shape: f32[1,512], index: 2, kind: input, shape index: {}]   ;;  %s1972_s3 = inlined_call_operand.hbm [shape: f32[512,128], index: 3, kind: input, shape index: {}]   ;;  %s1973_s4 = inlined_call_operand.vmem [shape: f32[1,128], index: 4, kind: input, shape index: {}]   ;;  %s1974_s5 = inlined_call_operand.hbm [shape: f32[128,128], index: 5, kind: input, shape index: {}]   ;;  %s1975_s6 = inlined_call_operand.hbm [shape: f32[16,128], index: 6, kind: output, shape index: {}]  }
   0x1   :  { %1979 = sst [smem:[#allocation15_spill]] %s1970_s1 }
   0x2   :  { %11 = vsyncpa [#allocation3], 0 }
   0x3   :  { %13 = vsyncpa [#allocation3 + $0x1], 0 }
   0x4   :  { %14 = vsyncpa [#allocation6], 0 }
   0x5   :  { %15 = vsyncpa [#allocation9], 0 }
   0x6   :  { %16 = vsyncpa [#allocation4], 0 }
   0x7   :  { %18 = vsyncpa [#allocation4 + $0x1], 0  ;;  %s1707_s21 = smov 0   ;;  %s1709_s22 = smov 0  }
   0x8   :  { %s1711_s23 = smov 0   ;;  %s1713_s24 = smov 0  }
   0x9 LB: > { %s1728_s25 = sadd.s32 4294967295, %s1658_s24   ;;  %s1025_s26 = sadd.s32 4294967294, %s1658_s24   ;;  %s1658_s24 = sphi %s1713_s24, %s2000_s24   ;;  %s1654_s23 = sphi %s1711_s23, %s1999_s23   ;;  %s1650_s22 = sphi %s1709_s22, %s1998_s22   ;;  %s1646_s21 = sphi %s1707_s21, %s1997_s21  }
   0xa   : > { %p44_p0 = scmp.ne.s32.totalorder %s1650_s22, %s1646_s21  ;;  %p1976_p1 = scmp.eq.s32.totalorder %s1728_s25, 0 }
   0xb   : > { %p179_p3 = scmp.eq.s32.totalorder %s1025_s26, 1  ;;  %p1026_p5 = scmp.ge.s32.totalorder %s1658_s24, 1 }
   0xc   : > { %p1737_p4 = por %p1976_p1, %p44_p0  ;;  %p186_p7 = scmp.lt.s32.totalorder %s1658_s24, 3 }
   0xd   : > { %p1742_p6 = por %p179_p3, %p44_p0  ;;  %s1660_s30 = smov [#allocation5]  }
   0xe   : > { %s1980_s27 = scalar_select %p1737_p4, 1, 0 }
   0xf   : > { %s1981_s28 = scalar_select %p1742_p6, 1, 0 }
  0x10   : > { %p1747_p8 = pnand %p1026_p5, %p186_p7  ;;  %s198_s7 = sshll.u32 %s1660_s30, 4  ;;  %s1751_s7 = int_to_ptr.vmem [resolvable:$true] %s198_s7 }
  0x11   : > { %s1661_s9 = smov [#allocation7]   ;;  %s1984_s1 = sld [smem:[#allocation15_spill]] }
  0x12   : > { %s1982_s29 = scalar_select %p1747_p8, 1, 0 }
  0x13   : > { %p1400_p9 = pneg %p1747_p8  ;;  %s214_s10 = sshll.u32 %s1661_s9, 4  ;;  %s1762_s10 = int_to_ptr.vmem [resolvable:$true] %s214_s10 }
  0x15   : > { %p1758_p11 = pnand %p1400_p9, %p1976_p1 }
  0x17   : > { %s1470_s13 = scalar_lea.hbm %s1984_s1, 16384  ;;  %p1772_p13 = pneg %p1758_p11 }
  0x18   : > { %p1471_p12 = scmp.ne.s32.totalorder %s1984_s1, %s1470_s13  ;;  %p1477_p5 = scmp.lt.u32.totalorder %s1470_s13, %s1984_s1 }
  0x1a   : > { %p1473_p0 = pnand %p1772_p13, %p1471_p12 }
  0x1c   : > { %p1474_p3 = pneg %p1473_p0 }
  0x1e   : > { %p1479_p7 = pnand %p1477_p5, %p1474_p3 }
  0x20   : > { %1482 = shalt.err (!%p1479_p7)
}
  0x21   : > { %s1483_s19 = scalar_lea.vmem %s1751_s7, 16384  ;;  %p1491_p2 = scmp.lt.s32.totalorder %s1751_s7, %s1751_s7 }
  0x22   : > { %p1484_p9 = scmp.ne.s32.totalorder %s1751_s7, %s1483_s19  ;;  %p1492_p6 = scmp.lt.s32.totalorder %s1483_s19, %s1483_s19 }
  0x24   : > { %p1486_p10 = pnand %p1484_p9, %p1772_p13  ;;  %p1493_p12 = por %p1492_p6, %p1491_p2 }
  0x26   : > { %p1487_p1 = pneg %p1486_p10 }
  0x28   : > { %p1494_p0 = pnand %p1493_p12, %p1487_p1 }
  0x2a   : > { %1497 = shalt.err (!%p1494_p0)
}
  0x2b   : > { %s1662_s20 = smov 512   ;;  %s1663_s26 = smov 32  }
  0x2c   : > { %1403 = dma.hbm_to_vmem [thread:$0]  (!%p1758_p11), %s1984_s1, 16384, %s1751_s7, [#allocation6], %s1662_s20, %s1662_s20, %s1663_s26  }
  0x2d   : > { %s1498_s13 = scalar_lea.hbm %s1972_s3, 8192 }
  0x2e   : > { %p1499_p2 = scmp.ne.s32.totalorder %s1972_s3, %s1498_s13  ;;  %p1505_p10 = scmp.lt.u32.totalorder %s1498_s13, %s1972_s3 }
  0x30   : > { %p1501_p1 = pnand %p1499_p2, %p1772_p13 }
  0x32   : > { %p1502_p6 = pneg %p1501_p1 }
  0x34   : > { %p1507_p3 = pnand %p1505_p10, %p1502_p6 }
  0x36   : > { %1510 = shalt.err (!%p1507_p3)
}
  0x37   : > { %s1511_s7 = scalar_lea.vmem %s1762_s10, 8192  ;;  %p1519_p12 = scmp.lt.s32.totalorder %s1762_s10, %s1762_s10 }
  0x38   : > { %p1512_p5 = scmp.ne.s32.totalorder %s1762_s10, %s1511_s7  ;;  %p1520_p0 = scmp.lt.s32.totalorder %s1511_s7, %s1511_s7 }
  0x3a   : > { %p1514_p7 = pnand %p1512_p5, %p1772_p13  ;;  %p1521_p2 = por %p1520_p0, %p1519_p12 }
  0x3c   : > { %p1515_p9 = pneg %p1514_p7 }
  0x3e   : > { %p1522_p1 = pnand %p1521_p2, %p1515_p9 }
  0x40   : > { %1525 = shalt.err (!%p1522_p1)
}
  0x41   : > { %s1664_s19 = smov 128   ;;  %s1665_s20 = smov 8  }
  0x42   : > { %1406 = dma.hbm_to_vmem [thread:$0]  (!%p1758_p11), %s1972_s3, 8192, %s1762_s10, [#allocation6], %s1664_s19, %s1664_s19, %s1665_s20  }
  0x43   : > { %s1666_s9 = smov [#allocation8]   ;;  %s1817_s12 = sadd.s32 1, %s1658_s24  }
  0x44   : > { %s230_s11 = sshll.u32 %s1666_s9, 4  ;;  %s1526_s15 = scalar_lea.hbm %s1974_s5, 2048  ;;  %s231_s11 = int_to_ptr.vmem [resolvable:$true] %s230_s11 }
  0x45   : > { %p1527_p6 = scmp.ne.s32.totalorder %s1974_s5, %s1526_s15  ;;  %p1533_p5 = scmp.lt.u32.totalorder %s1526_s15, %s1974_s5 }
  0x47   : > { %p1529_p10 = pnand %p1527_p6, %p1772_p13 }
  0x49   : > { %p1530_p3 = pneg %p1529_p10 }
  0x4b   : > { %p1535_p7 = pnand %p1533_p5, %p1530_p3 }
  0x4d   : > { %1538 = shalt.err (!%p1535_p7)
}
  0x4e   : > { %s1539_s10 = scalar_lea.vmem %s231_s11, 2048  ;;  %p1547_p2 = scmp.lt.s32.totalorder %s231_s11, %s231_s11 }
  0x4f   : > { %p1540_p9 = scmp.ne.s32.totalorder %s231_s11, %s1539_s10  ;;  %p1548_p1 = scmp.lt.s32.totalorder %s1539_s10, %s1539_s10 }
  0x51   : > { %p1542_p12 = pnand %p1540_p9, %p1772_p13  ;;  %p1549_p4 = por %p1548_p1, %p1547_p2 }
  0x53   : > { %p1543_p0 = pneg %p1542_p12 }
  0x55   : > { %p1550_p8 = pnand %p1549_p4, %p1543_p0 }
  0x57   : > { %1553 = shalt.err (!%p1550_p8)
}
  0x58   : > { %1409 = dma.hbm_to_vmem [thread:$0]  (!%p1758_p11), %s1974_s5, 2048, %s231_s11, [#allocation9], %s1664_s19, %s1664_s19, %s1665_s20  }
  0x59   : > { %s28_s1 = ssub.s32 %s1658_s24, %s1817_s12  ;;  %s31_s16 = sadd.s32 1, %s1654_s23 }
  0x5a   : > { %p29_p4 = scmp.eq.s32.totalorder %s28_s1, 0  ;;  %p38_p8 = scmp.ne.s32.totalorder %s1654_s23, %s1650_s22 }
  0x5b   : > { %p39_p13 = scmp.eq.s32.totalorder %s1658_s24, 0  ;;  %p1421_p6 = scmp.lt.s32.totalorder %s1658_s24, 2 }
  0x5c   : > { %s1845_s8 = scalar_select %p29_p4, %s1654_s23, %s31_s16  }
  0x5d   : > { %p40_p10 = por %p39_p13, %p38_p8  ;;  %p1986_p3 = scmp.eq.s32.totalorder %s1728_s25, 1 }
  0x5e   : > { %s244_s13 = sand.u32 1, %s1654_s23   ;;  %s1045_s14 = sshll.u32 %s1658_s24, 8 }
  0x5f   : > { %p1849_p5 = por %p1986_p3, %p38_p8  ;;  %s1031_s15 = sshll.u32 %s244_s13, 4 }
  0x60   : > { %s1858_s19 = scalar_lea.hbm %s1969_s0, %s1045_s14  ;;  %s248_s20 = scalar_lea.vmem [#allocation2], %s1031_s15 }
  0x61   : > { %s256_s11 = sshll.u32 %s248_s20, 4  ;;  %p1860_p11 = pnand %p1421_p6, %p40_p10  ;;  %s1864_s11 = int_to_ptr.vmem [resolvable:$true] %s256_s11 }
  0x62   : > { %s245_s10 = scalar_lea.sflag [#allocation3], %s244_s13  ;;  %s1554_s26 = scalar_lea.hbm %s1858_s19, 256 }
  0x63   : > { %p1555_p7 = scmp.ne.s32.totalorder %s1858_s19, %s1554_s26  ;;  %p1556_p9 = pneg %p1860_p11 }
  0x64   : > { %s1559_s16 = scalar_lea.hbm %s1969_s0, 512  ;;  %p1560_p2 = scmp.lt.u32.totalorder %s1858_s19, %s1969_s0 }
  0x65   : > { %p1557_p12 = pnand %p1556_p9, %p1555_p7  ;;  %p1561_p1 = scmp.lt.u32.totalorder %s1559_s16, %s1554_s26 }
  0x66   : > { %p1563_p8 = scmp.lt.u32.totalorder %s1554_s26, %s1858_s19 }
  0x67   : > { %p1558_p0 = pneg %p1557_p12  ;;  %p1562_p4 = por %p1561_p1, %p1560_p2 }
  0x69   : > { %p1564_p13 = por %p1563_p8, %p1562_p4 }
  0x6b   : > { %p1565_p6 = pnand %p1564_p13, %p1558_p0 }
  0x6d   : > { %1568 = shalt.err (!%p1565_p6)
}
  0x6e   : > { %s1569_s13 = scalar_lea.vmem %s1864_s11, 256  ;;  %s1667_s17 = smov [#allocation2]  }
  0x6f   : > { %p1570_p10 = scmp.ne.s32.totalorder %s1864_s11, %s1569_s13  ;;  %s1574_s18 = sshll.u32 %s1667_s17, 4  ;;  %s1575_s18 = int_to_ptr.vmem [resolvable:$false] %s1574_s18 }
  0x70   : > { %s1576_s20 = scalar_lea.vmem %s1575_s18, 512  ;;  %p1577_p12 = scmp.lt.s32.totalorder %s1864_s11, %s1575_s18 }
  0x71   : > { %p1572_p3 = pnand %p1570_p10, %p1556_p9  ;;  %p1578_p2 = scmp.lt.s32.totalorder %s1576_s20, %s1569_s13 }
  0x73   : > { %p1573_p7 = pneg %p1572_p3  ;;  %p1579_p1 = por %p1578_p2, %p1577_p12 }
  0x75   : > { %p1580_p4 = pnand %p1579_p1, %p1573_p7 }
  0x77   : > { %1583 = shalt.err (!%p1580_p4)
}
  0x78   : > { %1413 = dma.hbm_to_vmem [thread:$0]  (!%p1860_p11), %s1858_s19, 256, %s1864_s11, %s245_s10  }
  0x79   : > { %p1989_p0 = scmp.ne.s32.totalorder %s1982_s29, 0 }
  0x7a   : > { %s1894_s26 = sand.u32 (!%p1989_p0), 1, %s1650_s22   ;;  %p1990_p9 = scmp.ne.s32.totalorder (!%p1989_p0), %s1980_s27, 0 }
  0x7b   : > { %265 = sbr.rel (%p1989_p0) target bundleno = 886 (0x376), region = 44  ;;  %s1035_s30 = sshll.u32 (!%p1989_p0), %s1894_s26, 4 }
  0x7c   : > { %s268_s1 = scalar_lea.sflag (!%p1989_p0), [#allocation3], %s1894_s26  ;;  %s1898_s16 = scalar_lea.vmem (!%p1989_p0), [#allocation2], %s1035_s30 }
  0x82   : > { %1629 = dma.done.wait (%p1990_p9), %s268_s1, 256  }
  0x83   : > { %1631 = vsyncadd (%p1990_p9), %s268_s1, 4294967040  ;;  %p1991_p11 = scmp.eq.s32.totalorder %s1728_s25, 0 }
  0x85   : > { %1633 = dma.done.wait (%p1991_p11), [#allocation6], 24576   ;;  %p1992_p8 = pmov %p1991_p11 }
  0x87   : > { %1635 = vsyncadd (%p1992_p8), [#allocation6], 4294942720  ;;  %p1993_p13 = pmov %p1992_p8 }
  0x88   : > { %p1994_p6 = pmov %p1992_p8 }
  0x89   : > { %1637 = dma.done.wait (%p1993_p13), [#allocation9], 2048  }
  0x8a   : > { %1639 = vsyncadd (%p1994_p6), [#allocation9], 4294965248  ;;  %v315_v0 = vld [vmem:[#allocation5 + $0x8] sm:$0xff]  ;;  %v317_v2 = vld [vmem:[#allocation5 + $0x18] sm:$0xff]  ;;  %vm1669_vm0 = vmmov 0   ;;  %s1039_s7 = sshll.u32 %s1894_s26, 3 }
  0x8b   : > { %v319_v1 = vld [vmem:[#allocation5 + $0x28] sm:$0xff]  ;;  %v321_v4 = vld [vmem:[#allocation5 + $0x38] sm:$0xff]  ;;  %v314_v5 = vld [vmem:[#allocation5] sm:$0xff]  ;;  %s1042_s10 = sshll.u32 %s1728_s25, 7  ;;  %s311_s14 = scalar_lea.vmem [#allocation10], %s1039_s7 }
  0x8c   : > { %v1168_v3 = vpack.c.bf16 %v319_v1, %v315_v0  ;;  %v318_v6 = vld [vmem:[#allocation5 + $0x20] sm:$0xff]  ;;  %v1232_v7 = vpack.c.bf16 %v321_v4, %v317_v2  ;;  %v316_v9 = vld [vmem:[#allocation5 + $0x10] sm:$0xff]  ;;  %v323_v11 = vld [vmem:[#allocation5 + $0x48] sm:$0xff]  ;;  %s926_s15 = sshll.u32 %s311_s14, 4  ;;  %s1925_s18 = scalar_lea.hbm %s1975_s6, %s1042_s10  ;;  %s1927_s15 = int_to_ptr.vmem [resolvable:$true] %s926_s15 }
  0x8d   : > { %v1170_v8 = vpack.c.bf16 %v318_v6, %v314_v5  ;;  %v320_v10 = vld [vmem:[#allocation5 + $0x30] sm:$0xff]  ;;  %v327_v13 = vld [vmem:[#allocation5 + $0x68] sm:$0xff]  ;;  %v325_v14 = vld [vmem:[#allocation5 + $0x58] sm:$0xff]  ;;  %s913_s20 = scalar_lea.sflag [#allocation4], %s1894_s26  ;;  %s1584_s30 = scalar_lea.vmem %s1927_s15, 128 }
  0x8e   : > { %1169 = vmatprep.subr.bf16.mxu0 %v1168_v3  ;;  %v1234_v12 = vpack.c.bf16 %v320_v10, %v316_v9  ;;  %v329_v15 = vld [vmem:[#allocation5 + $0x78] sm:$0xff]  ;;  %1233 = vmatprep.subr.bf16.mxu1 %v1232_v7  ;;  %v1172_v16 = vpack.c.bf16 %v327_v13, %v323_v11  ;;  %v322_v18 = vld [vmem:[#allocation5 + $0x40] sm:$0xff]  ;;  %v324_v20 = vld [vmem:[#allocation5 + $0x50] sm:$0xff]  ;;  %p1585_p10 = scmp.ne.s32.totalorder %s1927_s15, %s1584_s30  ;;  %s1671_s25 = smov [#allocation10]  }
  0x8f   : > { %1171 = vmatpush1.bf16.msra.mxu0 %v1170_v8  ;;  %v1236_v17 = vpack.c.bf16 %v329_v15, %v325_v14  ;;  %v326_v19 = vld [vmem:[#allocation5 + $0x60] sm:$0xff]  ;;  %v328_v22 = vld [vmem:[#allocation5 + $0x70] sm:$0xff]  ;;  %v331_v23 = vld [vmem:[#allocation5 + $0x88] sm:$0xff]  ;;  %s1588_s1 = sshll.u32 %s1671_s25, 4  ;;  %s1589_s1 = int_to_ptr.vmem [resolvable:$false] %s1588_s1 }
  0x90   : > { %1235 = vmatpush1.bf16.msra.mxu1 %v1234_v12  ;;  %v1174_v21 = vpack.c.bf16 %v326_v19, %v322_v18  ;;  %v335_v24 = vld [vmem:[#allocation5 + $0xa8] sm:$0xff]  ;;  %1173 = vmatprep.subr.bf16.mxu0 %v1172_v16  ;;  %v1238_v25 = vpack.c.bf16 %v328_v22, %v324_v20  ;;  %v333_v27 = vld [vmem:[#allocation5 + $0x98] sm:$0xff]  ;;  %v330_v29 = vld [vmem:[#allocation5 + $0x80] sm:$0xff]  ;;  %p1586_p3 = pnand %p1585_p10, %p1849_p5  ;;  %p1591_p12 = scmp.lt.s32.totalorder %s1927_s15, %s1589_s1 }
  0x91   : > { %1237 = vmatprep.subr.bf16.mxu1 %v1236_v17  ;;  %v1176_v26 = vpack.c.bf16 %v335_v24, %v331_v23  ;;  %v337_v28 = vld [vmem:[#allocation5 + $0xb8] sm:$0xff]  ;;  %v334_v31 = vld [vmem:[#allocation5 + $0xa0] sm:$0xff]  ;;  %v332_v32 = vld [vmem:[#allocation5 + $0x90] sm:$0xff] }
  0x92   : > { %v1240_v30 = vpack.c.bf16 %v337_v28, %v333_v27  ;;  %v336_v33 = vld [vmem:[#allocation5 + $0xb0] sm:$0xff]  ;;  %v1178_v34 = vpack.c.bf16 %v334_v31, %v330_v29  ;;  %v339_v35 = vld [vmem:[#allocation5 + $0xc8] sm:$0xff]  ;;  %v341_v37 = vld [vmem:[#allocation5 + $0xd8] sm:$0xff]  ;;  %p1587_p7 = pneg %p1586_p3 }
  0x93   : > { %1175 = vmatpush1.bf16.msra.mxu0 %v1174_v21  ;;  %v343_v36 = vld [vmem:[#allocation5 + $0xe8] sm:$0xff]  ;;  %v1242_v38 = vpack.c.bf16 %v336_v33, %v332_v32  ;;  %v345_v40 = vld [vmem:[#allocation5 + $0xf8] sm:$0xff]  ;;  %v338_v41 = vld [vmem:[#allocation5 + $0xc0] sm:$0xff] }
  0x94   : > { %1239 = vmatpush1.bf16.msra.mxu1 %v1238_v25  ;;  %1177 = vmatprep.subr.bf16.mxu0 %v1176_v26  ;;  %v1180_v39 = vpack.c.bf16 %v343_v36, %v339_v35  ;;  %v342_v42 = vld [vmem:[#allocation5 + $0xe0] sm:$0xff]  ;;  %v1244_v43 = vpack.c.bf16 %v345_v40, %v341_v37  ;;  %v340_v44 = vld [vmem:[#allocation5 + $0xd0] sm:$0xff]  ;;  %v347_v46 = vld [vmem:[#allocation5 + $0x108] sm:$0xff] }
  0x95   : > { %1241 = vmatprep.subr.bf16.mxu1 %v1240_v30  ;;  %v344_v45 = vld [vmem:[#allocation5 + $0xf0] sm:$0xff]  ;;  %v351_v47 = vld [vmem:[#allocation5 + $0x128] sm:$0xff]  ;;  %v349_v48 = vld [vmem:[#allocation5 + $0x118] sm:$0xff]  ;;  %v1182_v50 = vpack.c.bf16 %v342_v42, %v338_v41 }
  0x96   : > { %v353_v49 = vld [vmem:[#allocation5 + $0x138] sm:$0xff]  ;;  %v1246_v51 = vpack.c.bf16 %v344_v45, %v340_v44  ;;  %v1184_v52 = vpack.c.bf16 %v351_v47, %v347_v46  ;;  %v346_v53 = vld [vmem:[#allocation5 + $0x100] sm:$0xff]  ;;  %v348_v55 = vld [vmem:[#allocation5 + $0x110] sm:$0xff] }
  0x97   : > { %1179 = vmatpush1.bf16.msra.mxu0 %v1178_v34  ;;  %v350_v54 = vld [vmem:[#allocation5 + $0x120] sm:$0xff]  ;;  %v1248_v56 = vpack.c.bf16 %v353_v49, %v349_v48  ;;  %v352_v57 = vld [vmem:[#allocation5 + $0x130] sm:$0xff]  ;;  %v355_v58 = vld [vmem:[#allocation5 + $0x148] sm:$0xff] }
  0x98   : > { %1243 = vmatpush1.bf16.msra.mxu1 %v1242_v38  ;;  %1181 = vmatprep.subr.bf16.mxu0 %v1180_v39  ;;  %v359_v59 = vld [vmem:[#allocation5 + $0x168] sm:$0xff]  ;;  %v357_v60 = vld [vmem:[#allocation5 + $0x158] sm:$0xff]  ;;  %v1186_v62 = vpack.c.bf16 %v350_v54, %v346_v53  ;;  %v1250_v63 = vpack.c.bf16 %v352_v57, %v348_v55  ;;  %v354_v1 = vld [vmem:[#allocation5 + $0x140] sm:$0xff] }
  0x99   : > { %1245 = vmatprep.subr.bf16.mxu1 %v1244_v43  ;;  %v361_v61 = vld [vmem:[#allocation5 + $0x178] sm:$0xff]  ;;  %v1188_v0 = vpack.c.bf16 %v359_v59, %v355_v58  ;;  %v358_v2 = vld [vmem:[#allocation5 + $0x160] sm:$0xff]  ;;  %v356_v3 = vld [vmem:[#allocation5 + $0x150] sm:$0xff] }
  0x9a   : > { %v1252_v4 = vpack.c.bf16 %v361_v61, %v357_v60  ;;  %v360_v5 = vld [vmem:[#allocation5 + $0x170] sm:$0xff]  ;;  %v363_v6 = vld [vmem:[#allocation5 + $0x188] sm:$0xff]  ;;  %v365_v8 = vld [vmem:[#allocation5 + $0x198] sm:$0xff]  ;;  %v1190_v10 = vpack.c.bf16 %v358_v2, %v354_v1 }
  0x9b   : > { %1183 = vmatpush1.bf16.msra.mxu0 %v1182_v50  ;;  %v367_v7 = vld [vmem:[#allocation5 + $0x1a8] sm:$0xff]  ;;  %v369_v9 = vld [vmem:[#allocation5 + $0x1b8] sm:$0xff]  ;;  %v1254_v11 = vpack.c.bf16 %v360_v5, %v356_v3  ;;  %v362_v13 = vld [vmem:[#allocation5 + $0x180] sm:$0xff] }
  0x9c   : > { %1247 = vmatpush1.bf16.msra.mxu1 %v1246_v51  ;;  %1185 = vmatprep.subr.bf16.mxu0 %v1184_v52  ;;  %v1192_v12 = vpack.c.bf16 %v367_v7, %v363_v6  ;;  %v366_v14 = vld [vmem:[#allocation5 + $0x1a0] sm:$0xff]  ;;  %v364_v15 = vld [vmem:[#allocation5 + $0x190] sm:$0xff]  ;;  %v1256_v16 = vpack.c.bf16 %v369_v9, %v365_v8  ;;  %v371_v18 = vld [vmem:[#allocation5 + $0x1c8] sm:$0xff] }
  0x9d   : > { %1249 = vmatprep.subr.bf16.mxu1 %v1248_v56  ;;  %v368_v17 = vld [vmem:[#allocation5 + $0x1b0] sm:$0xff]  ;;  %v375_v19 = vld [vmem:[#allocation5 + $0x1e8] sm:$0xff]  ;;  %v373_v20 = vld [vmem:[#allocation5 + $0x1d8] sm:$0xff]  ;;  %v1194_v22 = vpack.c.bf16 %v366_v14, %v362_v13 }
  0x9e   : > { %v377_v21 = vld [vmem:[#allocation5 + $0x1f8] sm:$0xff]  ;;  %v1258_v23 = vpack.c.bf16 %v368_v17, %v364_v15  ;;  %v1196_v24 = vpack.c.bf16 %v375_v19, %v371_v18  ;;  %v370_v25 = vld [vmem:[#allocation5 + $0x1c0] sm:$0xff]  ;;  %v372_v27 = vld [vmem:[#allocation5 + $0x1d0] sm:$0xff] }
  0x9f   : > { %1187 = vmatpush1.bf16.msra.mxu0 %v1186_v62  ;;  %v374_v26 = vld [vmem:[#allocation5 + $0x1e0] sm:$0xff]  ;;  %v1260_v28 = vpack.c.bf16 %v377_v21, %v373_v20  ;;  %v376_v29 = vld [vmem:[#allocation5 + $0x1f0] sm:$0xff]  ;;  %v379_v30 = vld [vmem:[#allocation5 + $0x208] sm:$0xff] }
  0xa0   : > { %1251 = vmatpush1.bf16.msra.mxu1 %v1250_v63  ;;  %1189 = vmatprep.subr.bf16.mxu0 %v1188_v0  ;;  %v383_v31 = vld [vmem:[#allocation5 + $0x228] sm:$0xff]  ;;  %v381_v32 = vld [vmem:[#allocation5 + $0x218] sm:$0xff]  ;;  %v1198_v34 = vpack.c.bf16 %v374_v26, %v370_v25  ;;  %v1262_v35 = vpack.c.bf16 %v376_v29, %v372_v27  ;;  %v378_v37 = vld [vmem:[#allocation5 + $0x200] sm:$0xff] }
  0xa1   : > { %1253 = vmatprep.subr.bf16.mxu1 %v1252_v4  ;;  %v385_v33 = vld [vmem:[#allocation5 + $0x238] sm:$0xff]  ;;  %v1200_v36 = vpack.c.bf16 %v383_v31, %v379_v30  ;;  %v382_v38 = vld [vmem:[#allocation5 + $0x220] sm:$0xff]  ;;  %v380_v39 = vld [vmem:[#allocation5 + $0x210] sm:$0xff] }
  0xa2   : > { %v1264_v40 = vpack.c.bf16 %v385_v33, %v381_v32  ;;  %v384_v41 = vld [vmem:[#allocation5 + $0x230] sm:$0xff]  ;;  %v387_v42 = vld [vmem:[#allocation5 + $0x248] sm:$0xff]  ;;  %v389_v44 = vld [vmem:[#allocation5 + $0x258] sm:$0xff]  ;;  %v1202_v46 = vpack.c.bf16 %v382_v38, %v378_v37 }
  0xa3   : > { %1191 = vmatpush1.bf16.msra.mxu0 %v1190_v10  ;;  %v391_v43 = vld [vmem:[#allocation5 + $0x268] sm:$0xff]  ;;  %v393_v45 = vld [vmem:[#allocation5 + $0x278] sm:$0xff]  ;;  %v1266_v47 = vpack.c.bf16 %v384_v41, %v380_v39  ;;  %v386_v49 = vld [vmem:[#allocation5 + $0x240] sm:$0xff] }
  0xa4   : > { %1255 = vmatpush1.bf16.msra.mxu1 %v1254_v11  ;;  %1193 = vmatprep.subr.bf16.mxu0 %v1192_v12  ;;  %v1204_v48 = vpack.c.bf16 %v391_v43, %v387_v42  ;;  %v390_v50 = vld [vmem:[#allocation5 + $0x260] sm:$0xff]  ;;  %v388_v51 = vld [vmem:[#allocation5 + $0x250] sm:$0xff]  ;;  %v1268_v52 = vpack.c.bf16 %v393_v45, %v389_v44  ;;  %v395_v54 = vld [vmem:[#allocation5 + $0x288] sm:$0xff] }
  0xa5   : > { %1257 = vmatprep.subr.bf16.mxu1 %v1256_v16  ;;  %v392_v53 = vld [vmem:[#allocation5 + $0x270] sm:$0xff]  ;;  %v399_v55 = vld [vmem:[#allocation5 + $0x2a8] sm:$0xff]  ;;  %v397_v56 = vld [vmem:[#allocation5 + $0x298] sm:$0xff]  ;;  %v1206_v58 = vpack.c.bf16 %v390_v50, %v386_v49 }
  0xa6   : > { %v401_v57 = vld [vmem:[#allocation5 + $0x2b8] sm:$0xff]  ;;  %v1270_v59 = vpack.c.bf16 %v392_v53, %v388_v51  ;;  %v1208_v60 = vpack.c.bf16 %v399_v55, %v395_v54  ;;  %v394_v61 = vld [vmem:[#allocation5 + $0x280] sm:$0xff]  ;;  %v396_v63 = vld [vmem:[#allocation5 + $0x290] sm:$0xff] }
  0xa7   : > { %1195 = vmatpush1.bf16.msra.mxu0 %v1194_v22  ;;  %v398_v62 = vld [vmem:[#allocation5 + $0x2a0] sm:$0xff]  ;;  %v1272_v0 = vpack.c.bf16 %v401_v57, %v397_v56  ;;  %v400_v1 = vld [vmem:[#allocation5 + $0x2b0] sm:$0xff]  ;;  %v403_v2 = vld [vmem:[#allocation5 + $0x2c8] sm:$0xff] }
  0xa8   : > { %1259 = vmatpush1.bf16.msra.mxu1 %v1258_v23  ;;  %1197 = vmatprep.subr.bf16.mxu0 %v1196_v24  ;;  %v407_v3 = vld [vmem:[#allocation5 + $0x2e8] sm:$0xff]  ;;  %v405_v4 = vld [vmem:[#allocation5 + $0x2d8] sm:$0xff]  ;;  %v1210_v6 = vpack.c.bf16 %v398_v62, %v394_v61  ;;  %v402_v7 = vld [vmem:[#allocation5 + $0x2c0] sm:$0xff]  ;;  %v1274_v8 = vpack.c.bf16 %v400_v1, %v396_v63 }
  0xa9   : > { %1261 = vmatprep.subr.bf16.mxu1 %v1260_v28  ;;  %v409_v5 = vld [vmem:[#allocation5 + $0x2f8] sm:$0xff]  ;;  %v1212_v9 = vpack.c.bf16 %v407_v3, %v403_v2  ;;  %v406_v10 = vld [vmem:[#allocation5 + $0x2e0] sm:$0xff]  ;;  %v404_v11 = vld [vmem:[#allocation5 + $0x2d0] sm:$0xff] }
  0xaa   : > { %v408_v12 = vld [vmem:[#allocation5 + $0x2f0] sm:$0xff]  ;;  %v1276_v13 = vpack.c.bf16 %v409_v5, %v405_v4  ;;  %v411_v14 = vld [vmem:[#allocation5 + $0x308] sm:$0xff]  ;;  %v413_v17 = vld [vmem:[#allocation5 + $0x318] sm:$0xff]  ;;  %v1214_v19 = vpack.c.bf16 %v406_v10, %v402_v7 }
  0xab   : > { %1199 = vmatpush1.bf16.msra.mxu0 %v1198_v34  ;;  %v415_v15 = vld [vmem:[#allocation5 + $0x328] sm:$0xff]  ;;  %v417_v18 = vld [vmem:[#allocation5 + $0x338] sm:$0xff]  ;;  %v1278_v20 = vpack.c.bf16 %v408_v12, %v404_v11  ;;  %v410_v22 = vld [vmem:[#allocation5 + $0x300] sm:$0xff] }
  0xac   : > { %1263 = vmatpush1.bf16.msra.mxu1 %v1262_v35  ;;  %1201 = vmatprep.subr.bf16.mxu0 %v1200_v36  ;;  %v313_v16 = vld [vmem:[%s1898_s16 + $0x8] sm:$0xff]  ;;  %v1216_v21 = vpack.c.bf16 %v415_v15, %v411_v14  ;;  %v414_v23 = vld [vmem:[#allocation5 + $0x320] sm:$0xff]  ;;  %v412_v24 = vld [vmem:[#allocation5 + $0x310] sm:$0xff]  ;;  %v1280_v25 = vpack.c.bf16 %v417_v18, %v413_v17 }
  0xad   : > { %1265 = vmatprep.subr.bf16.mxu1 %v1264_v40  ;;  %528 = vmatprep.mubr.f32.mxu0 %v313_v16  ;;  %v416_v26 = vld [vmem:[#allocation5 + $0x330] sm:$0xff]  ;;  %v419_v27 = vld [vmem:[#allocation5 + $0x348] sm:$0xff]  ;;  %v421_v29 = vld [vmem:[#allocation5 + $0x358] sm:$0xff]  ;;  %v1218_v31 = vpack.c.bf16 %v414_v23, %v410_v22 }
  0xae   : > { %599 = vmatprep.mubr.f32.mxu1 %v313_v16  ;;  %v423_v28 = vld [vmem:[#allocation5 + $0x368] sm:$0xff]  ;;  %v425_v30 = vld [vmem:[#allocation5 + $0x378] sm:$0xff]  ;;  %v1282_v32 = vpack.c.bf16 %v416_v26, %v412_v24  ;;  %v418_v34 = vld [vmem:[#allocation5 + $0x340] sm:$0xff] }
  0xaf   : > { %1203 = vmatpush1.bf16.msra.mxu0 %v1202_v46  ;;  %v1220_v33 = vpack.c.bf16 %v423_v28, %v419_v27  ;;  %v422_v35 = vld [vmem:[#allocation5 + $0x360] sm:$0xff]  ;;  %v420_v36 = vld [vmem:[#allocation5 + $0x350] sm:$0xff]  ;;  %v1284_v37 = vpack.c.bf16 %v425_v30, %v421_v29  ;;  %v427_v39 = vld [vmem:[#allocation5 + $0x388] sm:$0xff] }
  0xb0   : > { %1267 = vmatpush1.bf16.msra.mxu1 %v1266_v47  ;;  %1205 = vmatprep.subr.bf16.mxu0 %v1204_v48  ;;  %v424_v38 = vld [vmem:[#allocation5 + $0x370] sm:$0xff]  ;;  %v431_v40 = vld [vmem:[#allocation5 + $0x3a8] sm:$0xff]  ;;  %v429_v41 = vld [vmem:[#allocation5 + $0x398] sm:$0xff]  ;;  %v1222_v43 = vpack.c.bf16 %v422_v35, %v418_v34 }
  0xb1   : > { %1269 = vmatprep.subr.bf16.mxu1 %v1268_v52  ;;  %v433_v42 = vld [vmem:[#allocation5 + $0x3b8] sm:$0xff]  ;;  %v1286_v44 = vpack.c.bf16 %v424_v38, %v420_v36  ;;  %v1224_v45 = vpack.c.bf16 %v431_v40, %v427_v39  ;;  %v426_v46 = vld [vmem:[#allocation5 + $0x380] sm:$0xff]  ;;  %v428_v48 = vld [vmem:[#allocation5 + $0x390] sm:$0xff] }
  0xb2   : > { %v430_v47 = vld [vmem:[#allocation5 + $0x3a0] sm:$0xff]  ;;  %v1288_v49 = vpack.c.bf16 %v433_v42, %v429_v41  ;;  %v432_v50 = vld [vmem:[#allocation5 + $0x3b0] sm:$0xff]  ;;  %v435_v51 = vld [vmem:[#allocation5 + $0x3c8] sm:$0xff] }
  0xb3   : > { %1207 = vmatpush1.bf16.msra.mxu0 %v1206_v58  ;;  %v439_v52 = vld [vmem:[#allocation5 + $0x3e8] sm:$0xff]  ;;  %v437_v53 = vld [vmem:[#allocation5 + $0x3d8] sm:$0xff]  ;;  %v1226_v55 = vpack.c.bf16 %v430_v47, %v426_v46  ;;  %v1290_v56 = vpack.c.bf16 %v432_v50, %v428_v48  ;;  %v434_v58 = vld [vmem:[#allocation5 + $0x3c0] sm:$0xff] }
  0xb4   : > { %1271 = vmatpush1.bf16.msra.mxu1 %v1270_v59  ;;  %1209 = vmatprep.subr.bf16.mxu0 %v1208_v60  ;;  %v441_v54 = vld [vmem:[#allocation5 + $0x3f8] sm:$0xff]  ;;  %v1228_v57 = vpack.c.bf16 %v439_v52, %v435_v51  ;;  %v438_v59 = vld [vmem:[#allocation5 + $0x3e0] sm:$0xff]  ;;  %v436_v60 = vld [vmem:[#allocation5 + $0x3d0] sm:$0xff] }
  0xb5   : > { %1273 = vmatprep.subr.bf16.mxu1 %v1272_v0  ;;  %v1292_v61 = vpack.c.bf16 %v441_v54, %v437_v53  ;;  %v440_v62 = vld [vmem:[#allocation5 + $0x3f0] sm:$0xff]  ;;  %v626_v63 = vld [vmem:[#allocation7 + $0x80] sm:$0xff]  ;;  %v627_v0 = vld [vmem:[#allocation7 + $0x88] sm:$0xff]  ;;  %v1230_v3 = vpack.c.bf16 %v438_v59, %v434_v58 }
  0xb6   : > { %v658_v1 = vld [vmem:[#allocation7 + $0x180] sm:$0xff]  ;;  %v659_v2 = vld [vmem:[#allocation7 + $0x188] sm:$0xff]  ;;  %v1294_v4 = vpack.c.bf16 %v440_v62, %v436_v60  ;;  %v1296_v5 = vpack.c.bf16 %v627_v0, %v626_v63  ;;  %v628_v11 = vld [vmem:[#allocation7 + $0x90] sm:$0xff] }
  0xb7   : > { %1211 = vmatpush1.bf16.msra.mxu0 %v1210_v6  ;;  %v610_v6 = vld [vmem:[#allocation7] sm:$0xff]  ;;  %v611_v7 = vld [vmem:[#allocation7 + $0x8] sm:$0xff]  ;;  %v629_v12 = vld [vmem:[#allocation7 + $0x98] sm:$0xff] }
  0xb8   : > { %1275 = vmatpush1.bf16.msra.mxu1 %v1274_v8  ;;  %1213 = vmatprep.subr.bf16.mxu0 %v1212_v9  ;;  %v642_v8 = vld [vmem:[#allocation7 + $0x100] sm:$0xff]  ;;  %v1328_v9 = vpack.c.bf16 %v659_v2, %v658_v1  ;;  %v643_v10 = vld [vmem:[#allocation7 + $0x108] sm:$0xff]  ;;  %v661_v14 = vld [vmem:[#allocation7 + $0x198] sm:$0xff]  ;;  %v1298_v16 = vpack.c.bf16 %v611_v7, %v610_v6  ;;  %v1300_v18 = vpack.c.bf16 %v629_v12, %v628_v11 }
  0xb9   : > { %1277 = vmatprep.subr.bf16.mxu1 %v1276_v13  ;;  %v660_v13 = vld [vmem:[#allocation7 + $0x190] sm:$0xff]  ;;  %v1330_v17 = vpack.c.bf16 %v643_v10, %v642_v8  ;;  %v645_v23 = vld [vmem:[#allocation7 + $0x118] sm:$0xff]  ;;  %v630_v24 = vld [vmem:[#allocation7 + $0xa0] sm:$0xff] }
  0xba   : > { %v312_v15 = vld [vmem:[%s1898_s16] sm:$0xff]  ;;  %v1332_v22 = vpack.c.bf16 %v661_v14, %v660_v13  ;;  %v663_v27 = vld [vmem:[#allocation7 + $0x1a8] sm:$0xff]  ;;  %v665_v39 = vld [vmem:[#allocation7 + $0x1b8] sm:$0xff]  ;;  %s1590_s16 = scalar_lea.vmem %s1589_s1, 256 }
  0xbb   : > { %1215 = vmatpush1.bf16.msra.mxu0 %v1214_v19  ;;  %v612_v19 = vld [vmem:[#allocation7 + $0x10] sm:$0xff]  ;;  %v662_v26 = vld [vmem:[#allocation7 + $0x1a0] sm:$0xff]  ;;  %v647_v35 = vld [vmem:[#allocation7 + $0x128] sm:$0xff]  ;;  %p1592_p2 = scmp.lt.s32.totalorder %s1590_s16, %s1584_s30 }
  0xbc   : > { %1279 = vmatpush1.bf16.msra.mxu1 %v1278_v20  ;;  %1217 = vmatprep.subr.bf16.mxu0 %v1216_v21  ;;  %v613_v20 = vld [vmem:[#allocation7 + $0x18] sm:$0xff]  ;;  %v644_v21 = vld [vmem:[#allocation7 + $0x110] sm:$0xff]  ;;  %v1336_v34 = vpack.c.bf16 %v663_v27, %v662_v26  ;;  %v634_v48 = vld [vmem:[#allocation7 + $0xc0] sm:$0xff] }
  0xbd   : > { %1281 = vmatprep.subr.bf16.mxu1 %v1280_v25  ;;  %v631_v25 = vld [vmem:[#allocation7 + $0xa8] sm:$0xff]  ;;  %v1302_v28 = vpack.c.bf16 %v613_v20, %v612_v19  ;;  %v1334_v29 = vpack.c.bf16 %v645_v23, %v644_v21  ;;  %v632_v36 = vld [vmem:[#allocation7 + $0xb0] sm:$0xff]  ;;  %v649_v47 = vld [vmem:[#allocation7 + $0x138] sm:$0xff]  ;;  %p1593_p1 = por %p1592_p2, %p1591_p12 }
  0xbe   : > { %v1304_v30 = vpack.c.bf16 %v631_v25, %v630_v24  ;;  %v664_v38 = vld [vmem:[#allocation7 + $0x1b0] sm:$0xff]  ;;  %v666_v50 = vld [vmem:[#allocation7 + $0x1c0] sm:$0xff]  ;;  %v667_v51 = vld [vmem:[#allocation7 + $0x1c8] sm:$0xff] }
  0xbf   : > { %1219 = vmatpush1.bf16.msra.mxu0 %v1218_v31  ;;  %v614_v31 = vld [vmem:[#allocation7 + $0x20] sm:$0xff]  ;;  %v1340_v46 = vpack.c.bf16 %v665_v39, %v664_v38  ;;  %v1344_v58 = vpack.c.bf16 %v667_v51, %v666_v50  ;;  %v651_v59 = vld [vmem:[#allocation7 + $0x148] sm:$0xff]  ;;  %v636_v60 = vld [vmem:[#allocation7 + $0xd0] sm:$0xff]  ;;  %p1594_p4 = pnand %p1593_p1, %p1587_p7 }
  0xc0   : > { %1283 = vmatpush1.bf16.msra.mxu1 %v1282_v32  ;;  %1221 = vmatprep.subr.bf16.mxu0 %v1220_v33  ;;  %v615_v32 = vld [vmem:[#allocation7 + $0x28] sm:$0xff]  ;;  %v646_v33 = vld [vmem:[#allocation7 + $0x120] sm:$0xff]  ;;  %v668_v62 = vld [vmem:[#allocation7 + $0x1d0] sm:$0xff] }
  0xc1   : > { %1285 = vmatprep.subr.bf16.mxu1 %v1284_v37  ;;  %v633_v37 = vld [vmem:[#allocation7 + $0xb8] sm:$0xff]  ;;  %v1306_v40 = vpack.c.bf16 %v615_v32, %v614_v31  ;;  %v1338_v41 = vpack.c.bf16 %v647_v35, %v646_v33  ;;  %v638_v8 = vld [vmem:[#allocation7 + $0xe0] sm:$0xff]  ;;  %v671_v11 = vld [vmem:[#allocation7 + $0x1e8] sm:$0xff]  ;;  %v444_v35 = vlaneseq }
  0xc2   : > { %v1308_v42 = vpack.c.bf16 %v633_v37, %v632_v36  ;;  %v669_v63 = vld [vmem:[#allocation7 + $0x1d8] sm:$0xff]  ;;  %v670_v10 = vld [vmem:[#allocation7 + $0x1e0] sm:$0xff]  ;;  %v655_v20 = vld [vmem:[#allocation7 + $0x168] sm:$0xff] }
  0xc3   : > { %1223 = vmatpush1.bf16.msra.mxu0 %v1222_v43  ;;  %v616_v43 = vld [vmem:[#allocation7 + $0x30] sm:$0xff]  ;;  %v1348_v6 = vpack.c.bf16 %v669_v63, %v668_v62  ;;  %v653_v7 = vld [vmem:[#allocation7 + $0x158] sm:$0xff]  ;;  %v445_v36 = vshrl.u32 %v444_v35, 7  ;;  %v442_v38 = vld [vmem:[%s1971_s2] sm:$0xf] }
  0xc4   : > { %1287 = vmatpush1.bf16.msra.mxu1 %v1286_v44  ;;  %1225 = vmatprep.subr.bf16.mxu0 %v1224_v45  ;;  %v617_v44 = vld [vmem:[#allocation7 + $0x38] sm:$0xff]  ;;  %v648_v45 = vld [vmem:[#allocation7 + $0x130] sm:$0xff]  ;;  %v822_v50 = vld [vmem:[#allocation8] sm:$0xff] }
  0xc5   : > { %1289 = vmatprep.subr.bf16.mxu1 %v1288_v49  ;;  %v635_v49 = vld [vmem:[#allocation7 + $0xc8] sm:$0xff]  ;;  %v1310_v52 = vpack.c.bf16 %v617_v44, %v616_v43  ;;  %v1342_v53 = vpack.c.bf16 %v649_v47, %v648_v45  ;;  %v641_v23 = vld [vmem:[#allocation7 + $0xf8] sm:$0xff]  ;;  %v672_v24 = vld [vmem:[#allocation7 + $0x1f0] sm:$0xff]  ;;  %v446_v37 = vsub.s32 0, %v445_v36  ;;  %v454_v39 = vsub.s32 2, %v445_v36 }
  0xc6   : > { %v1312_v54 = vpack.c.bf16 %v635_v49, %v634_v48  ;;  %v673_v26 = vld [vmem:[#allocation7 + $0x1f8] sm:$0xff]  ;;  %v624_v27 = vld [vmem:[#allocation7 + $0x70] sm:$0xff]  ;;  %v823_v51 = vld [vmem:[#allocation8 + $0x8] sm:$0xff] }
  0xc7   : > { %1227 = vmatpush1.bf16.msra.mxu0 %v1226_v55  ;;  %v618_v55 = vld [vmem:[#allocation7 + $0x40] sm:$0xff]  ;;  %v656_v31 = vld [vmem:[#allocation7 + $0x170] sm:$0xff]  ;;  %v657_v32 = vld [vmem:[#allocation7 + $0x178] sm:$0xff]  ;;  %v455_v43 = vrot.slane %v442_v38, %v454_v39 }
  0xc8   : > { %1291 = vmatpush1.bf16.msra.mxu1 %v1290_v56  ;;  %1229 = vmatprep.subr.bf16.mxu0 %v1228_v57  ;;  %v619_v56 = vld [vmem:[#allocation7 + $0x48] sm:$0xff]  ;;  %v650_v57 = vld [vmem:[#allocation7 + $0x140] sm:$0xff]  ;;  %v1358_v33 = vpack.c.bf16 %v657_v32, %v656_v31  ;;  %v825_v62 = vld [vmem:[#allocation8 + $0x18] sm:$0xff] }
  0xc9   : > { %1293 = vmatprep.subr.bf16.mxu1 %v1292_v61  ;;  %v637_v61 = vld [vmem:[#allocation7 + $0xd8] sm:$0xff]  ;;  %v1314_v0 = vpack.c.bf16 %v619_v56, %v618_v55  ;;  %v1346_v1 = vpack.c.bf16 %v651_v59, %v650_v57 }
  0xca   : > { %v1316_v2 = vpack.c.bf16 %v637_v61, %v636_v60  ;;  %v824_v61 = vld [vmem:[#allocation8 + $0x10] sm:$0xff] }
  0xcb   : > { %1231 = vmatpush1.bf16.msra.mxu0 %v1230_v3  ;;  %v620_v3 = vld [vmem:[#allocation7 + $0x50] sm:$0xff]  ;;  %v1364_v63 = vpack.c.bf16 %v825_v62, %v824_v61 }
  0xcc   : > { %1295 = vmatpush1.bf16.msra.mxu1 %v1294_v4  ;;  %1297 = vmatprep.subr.bf16.mxu0 %v1296_v5  ;;  %v621_v4 = vld [vmem:[#allocation7 + $0x58] sm:$0xff]  ;;  %v652_v5 = vld [vmem:[#allocation7 + $0x150] sm:$0xff] }
  0xcd   : > { %1329 = vmatprep.subr.bf16.mxu1 %v1328_v9  ;;  %v639_v9 = vld [vmem:[#allocation7 + $0xe8] sm:$0xff]  ;;  %v1318_v12 = vpack.c.bf16 %v621_v4, %v620_v3  ;;  %v1350_v13 = vpack.c.bf16 %v653_v7, %v652_v5  ;;  %v828_v3 = vld [vmem:[#allocation8 + $0x30] sm:$0xff]  ;;  %v829_v4 = vld [vmem:[#allocation8 + $0x38] sm:$0xff] }
  0xce   : > { %529 = vmatmul.mubr.f32.vlgmr.msra.gmra.mrb[0].mxu0 %v312_v15  ;;  %v1320_v14 = vpack.c.bf16 %v639_v9, %v638_v8  ;;  %v1370_v5 = vpack.c.bf16 %v829_v4, %v828_v3  ;;  %v831_v7 = vld [vmem:[#allocation8 + $0x48] sm:$0xff]  ;;  %v832_v9 = vld [vmem:[#allocation8 + $0x50] sm:$0xff] }
  0xcf   : > { %600 = vmatmul.mubr.f32.vlgmr.msra.gmra.mrb[0].mxu1 %v312_v15  ;;  %1299 = vmatpush3.bf16.msra.mxu0 %v1298_v16  ;;  %v1352_v15 = vpack.c.bf16 %v671_v11, %v670_v10  ;;  %v622_v16 = vld [vmem:[#allocation7 + $0x60] sm:$0xff]  ;;  %v833_v10 = vld [vmem:[#allocation8 + $0x58] sm:$0xff] }
  0xd0   : > { %1331 = vmatpush3.bf16.msra.mxu1 %v1330_v17  ;;  %1301 = vmatprep.subr.bf16.mxu0 %v1300_v18  ;;  %v623_v17 = vld [vmem:[#allocation7 + $0x68] sm:$0xff]  ;;  %v654_v18 = vld [vmem:[#allocation7 + $0x160] sm:$0xff]  ;;  %v1376_v11 = vpack.c.bf16 %v833_v10, %v832_v9 }
  0xd1   : > { %1333 = vmatprep.subr.bf16.mxu1 %v1332_v22  ;;  %v1322_v19 = vpack.c.bf16 %v623_v17, %v622_v16  ;;  %v1354_v21 = vpack.c.bf16 %v655_v20, %v654_v18  ;;  %v640_v22 = vld [vmem:[#allocation7 + $0xf0] sm:$0xff]  ;;  %v837_v16 = vld [vmem:[#allocation8 + $0x78] sm:$0xff]  ;;  %v1670_v18 = vmov 0.0  }
  0xd2   : > { %v1324_v25 = vpack.c.bf16 %v641_v23, %v640_v22 }
  0xd3   : > { %1303 = vmatpush3.bf16.msra.mxu0 %v1302_v28  ;;  %v625_v28 = vld [vmem:[#allocation7 + $0x78] sm:$0xff] }
  0xd4   : > { %1335 = vmatpush3.bf16.msra.mxu1 %v1334_v29  ;;  %1305 = vmatprep.subr.bf16.mxu0 %v1304_v30  ;;  %v1356_v29 = vpack.c.bf16 %v673_v26, %v672_v24  ;;  %v1326_v30 = vpack.c.bf16 %v625_v28, %v624_v27 }
  0xd5   : > { %1337 = vmatprep.subr.bf16.mxu1 %v1336_v34  ;;  %v1668_v34 = vmov 0.0|0.0  }
  0xd7   : > { %1307 = vmatpush3.bf16.msra.mxu0 %v1306_v40  ;;  %v450_v40 = vsub.s32 1, %v445_v36 }
  0xd8   : > { %1339 = vmatpush3.bf16.msra.mxu1 %v1338_v41  ;;  %1309 = vmatprep.subr.bf16.mxu0 %v1308_v42  ;;  %v458_v41 = vsub.s32 3, %v445_v36  ;;  %v447_v42 = vrot.slane %v442_v38, %v446_v37 }
  0xd9   : > { %1341 = vmatprep.subr.bf16.mxu1 %v1340_v46  ;;  %v451_v44 = vrot.slane %v442_v38, %v450_v40 }
  0xda   : > { %v459_v45 = vrot.slane %v442_v38, %v458_v41 }
  0xdb   : > { %1311 = vmatpush3.bf16.msra.mxu0 %v1310_v52 }
  0xdc   : > { %1343 = vmatpush3.bf16.msra.mxu1 %v1342_v53  ;;  %1313 = vmatprep.subr.bf16.mxu0 %v1312_v54 }
  0xdd   : > { %1345 = vmatprep.subr.bf16.mxu1 %v1344_v58  ;;  %v1361_v58 = vpack.c.bf16 %v823_v51, %v822_v50 }
  0xdf   : > { %1315 = vmatpush3.bf16.msra.mxu0 %v1314_v0  ;;  %v826_v0 = vld [vmem:[#allocation8 + $0x20] sm:$0xff] }
  0xe0   : > { %1347 = vmatpush3.bf16.msra.mxu1 %v1346_v1  ;;  %1317 = vmatprep.subr.bf16.mxu0 %v1316_v2  ;;  %v827_v1 = vld [vmem:[#allocation8 + $0x28] sm:$0xff] }
  0xe1   : > { %1349 = vmatprep.subr.bf16.mxu1 %v1348_v6  ;;  %v1367_v2 = vpack.c.bf16 %v827_v1, %v826_v0  ;;  %v830_v6 = vld [vmem:[#allocation8 + $0x40] sm:$0xff] }
  0xe2   : > { %v1373_v8 = vpack.c.bf16 %v831_v7, %v830_v6 }
  0xe3   : > { %1319 = vmatpush3.bf16.msra.mxu0 %v1318_v12  ;;  %v834_v12 = vld [vmem:[#allocation8 + $0x60] sm:$0xff] }
  0xe4   : > { %1351 = vmatpush3.bf16.msra.mxu1 %v1350_v13  ;;  %1321 = vmatprep.subr.bf16.mxu0 %v1320_v14  ;;  %v835_v13 = vld [vmem:[#allocation8 + $0x68] sm:$0xff] }
  0xe5   : > { %1353 = vmatprep.subr.bf16.mxu1 %v1352_v15  ;;  %v1379_v14 = vpack.c.bf16 %v835_v13, %v834_v12  ;;  %v836_v15 = vld [vmem:[#allocation8 + $0x70] sm:$0xff] }
  0xe6   : > { %v1382_v17 = vpack.c.bf16 %v837_v16, %v836_v15 }
  0xe7   : > { %1323 = vmatpush3.bf16.msra.mxu0 %v1322_v19 }
  0xe8   : > { %1355 = vmatpush3.bf16.msra.mxu1 %v1354_v21  ;;  %1325 = vmatprep.subr.bf16.mxu0 %v1324_v25  ;;  %v1040_v21 = vld [vmem:[%s1973_s4] ss:$0 sm:$0xff] }
  0xe9   : > { %1357 = vmatprep.subr.bf16.mxu1 %v1356_v29 }
  0xeb   : > { %1327 = vmatpush3.bf16.msra.mxu0 %v1326_v30 }
  0xec   : > { %1359 = vmatpush3.bf16.msra.mxu1 %v1358_v33  ;;  %1360 = vmatprep.subr.bf16.mxu0 %v1668_v34 }
 0x1a1   : > { %v530_v46 = vpop.f32.mrb[0].mxu0 }
 0x1a2   : > { %v531_v47 = vadd.f32 %v530_v46, %v447_v42  ;;  %v601_v48 = vpop.f32.mrb[0].mxu1  ;;  %v532_v49 = vpop.f32.mrb[1].mxu0 }
 0x1a3   : > { %v602_v52 = vadd.f32 %v601_v48, %v455_v43  ;;  %v533_v53 = vadd.f32 %v532_v49, %v451_v44  ;;  %v603_v54 = vpop.f32.mrb[1].mxu1 }
 0x1a4   : > { %v604_v55 = vadd.f32 %v603_v54, %v459_v45  ;;  %v606_v59 = vmax.f32 %v531_v47, 0.0 }
 0x1a5   : > { %v608_v56 = vmax.f32 %v602_v52, 0.0  ;;  %v607_v57 = vmax.f32 %v533_v53, 0.0 }
 0x1a6   : > { %v609_v60 = vmax.f32 %v604_v55, 0.0 }
 0x1a7   : > { %745 = vmatprep.mubr.f32.mxu0 %v607_v57 }
 0x1a8   : > { %815 = vmatprep.mubr.f32.mxu1 %v609_v60  ;;  %746 = vmatmul.mubr.f32.vlgmr.msra.gmra.mrb[2].mxu0 %v606_v59 }
 0x1a9   : > { %816 = vmatmul.mubr.f32.vlgmr.msra.gmra.mrb[2].mxu1 %v608_v56  ;;  %1362 = vmatpush3.bf16.msra.mxu0 %v1361_v58 }
 0x1aa   : > { %1363 = vmatprep.subr.bf16.mxu0 %v1668_v34  ;;  %1165 = vmatprep.mubr.msk.f32.mxu0 %vm1669_vm0, %v1670_v18 }
 0x1ad   : > { %1365 = vmatpush3.bf16.msra.mxu0 %v1364_v63 }
 0x1ae   : > { %1366 = vmatprep.subr.bf16.mxu0 %v1668_v34 }
 0x1b1   : > { %1368 = vmatpush3.bf16.msra.mxu0 %v1367_v2 }
 0x1b2   : > { %1369 = vmatprep.subr.bf16.mxu0 %v1668_v34 }
 0x1b5   : > { %1371 = vmatpush3.bf16.msra.mxu0 %v1370_v5 }
 0x1b6   : > { %1372 = vmatprep.subr.bf16.mxu0 %v1668_v34 }
 0x1b9   : > { %1374 = vmatpush3.bf16.msra.mxu0 %v1373_v8 }
 0x1ba   : > { %1375 = vmatprep.subr.bf16.mxu0 %v1668_v34 }
 0x1bd   : > { %1377 = vmatpush3.bf16.msra.mxu0 %v1376_v11 }
 0x1be   : > { %1378 = vmatprep.subr.bf16.mxu0 %v1668_v34 }
 0x1c1   : > { %1380 = vmatpush3.bf16.msra.mxu0 %v1379_v14 }
 0x1c2   : > { %1381 = vmatprep.subr.bf16.mxu0 %v1668_v34 }
 0x1c5   : > { %1383 = vmatpush3.bf16.msra.mxu0 %v1382_v17 }
 0x27b   : > { %v1078_v19 = vpop.f32.mrb[2].mxu0 }
 0x27c   : > { %v1113_v20 = vpop.f32.mrb[2].mxu1  ;;  %v1079_v22 = vpop.f32.mrb[3].mxu0 }
 0x27d   : > { %v1080_v23 = vadd.f32 %v1079_v22, %v1078_v19  ;;  %v1114_v24 = vpop.f32.mrb[3].mxu1 }
 0x27e   : > { %v1115_v25 = vadd.f32 %v1114_v24, %v1113_v20 }
 0x27f   : > { %v748_v26 = vadd.f32 %v1080_v23, %v1040_v21 }
 0x281   : > { %v818_v27 = vadd.f32 %v1115_v25, %v748_v26 }
 0x283   : > { %v821_v28 = vmul.f32 %v818_v27, %v818_v27 }
 0x285   : > { %1166 = vmatmul.mubr.f32.vlgmr.msra.gmra.mrb[4].mxu0 %v821_v28 }
 0x358   : > { %v904_v29 = vpop.f32.mrb[4].mxu0 }
 0x359   : > { %v908_v30 = vmax.f32 %v904_v29, 1e-24  ;;  %v1167_v31 = vpop.f32.mrb[5].mxu0 }
 0x35b   : > { %1468 = vrsqrt.f32 %v908_v30 }
 0x365   : > { %v1469_v32 = vpop.eup %1468 }
 0x366   : > { %v910_v33 = vmul.f32 %v1469_v32, %v818_v27 }
 0x368   : > { %911 = vst [vmem:[%s311_s14] sm:$0xff] %v910_v33 }
 0x369   : > { %1597 = shalt.err (!%p1594_p4)
}
 0x36a   : > { %s1598_s26 = scalar_lea.hbm %s1925_s18, 128  ;;  %s1602_s19 = scalar_lea.hbm %s1975_s6, 256 }
 0x36b   : > { %p1599_p0 = scmp.ne.s32.totalorder %s1925_s18, %s1598_s26  ;;  %p1603_p8 = scmp.lt.u32.totalorder %s1925_s18, %s1975_s6 }
 0x36c   : > { %p1604_p13 = scmp.lt.u32.totalorder %s1602_s19, %s1598_s26  ;;  %p1606_p10 = scmp.lt.u32.totalorder %s1598_s26, %s1925_s18 }
 0x36d   : > { %p1600_p9 = pnand %p1599_p0, %p1849_p5 }
 0x36e   : > { %p1605_p6 = por %p1604_p13, %p1603_p8 }
 0x36f   : > { %p1601_p11 = pneg %p1600_p9 }
 0x370   : > { %p1607_p3 = por %p1606_p10, %p1605_p6 }
 0x372   : > { %p1608_p7 = pnand %p1607_p3, %p1601_p11 }
 0x374   : > { %1611 = shalt.err (!%p1608_p7)
}
 0x375   : > { %1398 = dma.vmem_to_hbm [thread:$0]  (%p1849_p5), %s1927_s15, 128, %s1925_s18, %s913_s20  }
 0x376 PF: > { %s938_s10 = sand.u32 1, %s1646_s21   ;;  %p1995_p12 = scmp.ne.s32.totalorder %s1981_s28, 0 }
 0x377   : > { %p1996_p2 = scmp.ge.s32.totalorder %s1658_s24, 2  ;;  %s939_s14 = scalar_lea.sflag [#allocation4], %s938_s10 }
 0x379   : > { %p1415_p1 = pnand %p1996_p2, %p1995_p12 }
 0x37b   : > { %1641 = dma.done.wait (!%p1415_p1), %s939_s14, 128  }
 0x37c   : > { %1643 = vsyncadd (!%p1415_p1), %s939_s14, 4294967168  ;;  %p21_p4 = scmp.ge.s32.totalorder %s1817_s12, 4   ;;  %s1997_s21 = smov %s1650_s22 }
 0x37d   : > { %s1998_s22 = smov %s1654_s23  ;;  %s1999_s23 = smov %s1845_s8 }
 0x37e   : > { %s2000_s24 = smov %s1817_s12  ;;  %23 = sbr.rel (!%p21_p4) target bundleno = 9 (0x9), region = 101 }
 0x385   :  { %944 = vsyncpa [#allocation3], 1 }
 0x386   :  { %946 = vsyncpa [#allocation3 + $0x1], 1 }
 0x387   :  { %947 = vsyncpa [#allocation6], 1 }
 0x388   :  { %948 = vsyncpa [#allocation9], 1 }
 0x389   :  { %949 = vsyncpa [#allocation4], 1 }
 0x38a   :  { %951 = vsyncpa [#allocation4 + $0x1], 1 }

</bundles_post_ra>
